<compile_context>
chip_gen: v5e
topology: v5e:2x2
jax: 0.10.0
libtpu: 0.0.40
codegen_flags: <defaults>
</compile_context>

<pallas_src>
import jax
import jax.numpy as jnp
from jax.experimental import pallas as pl
from jax.experimental.pallas import tpu as pltpu

# ---- model hyper-parameters (small, consistent with the module) ----
VOCAB = 64
EMB = 16
HID = 32
N_LAYERS = 2
N_CLASSES = 4
DROPOUT_P = 0.1          # identity at inference time
BATCH = 2
SEQ = 8
LN_EPS = 1e-5
FC1_DIM = 16

# ---- packed parameter slab layout (row offsets are multiples of 8) ----
OFF_EMB = 0                    # emb_proj = embedding @ W_ih0^T : (VOCAB, HID)  rows   0: 64
OFF_WHH0 = VOCAB               # W_hh0^T                        : (HID, HID)    rows  64: 96
OFF_W1 = OFF_WHH0 + HID        # [W_ih1^T ; W_hh1^T]            : (2H,  HID)    rows  96:160
OFF_FC1 = OFF_W1 + 2 * HID     # gamma-folded fc1_w^T           : (HID, 16)     rows 160:192
OFF_FC2 = OFF_FC1 + HID        # fc2_w^T                        : (16,  C)      rows 192:208
OFF_VEC = OFF_FC2 + FC1_DIM    # bias/vector rows               : (8,   32)     rows 208:216
SLAB_ROWS = OFF_VEC + 8        # 216
SLAB_COLS = HID                # 32


def sentiment_kernel(ids_ref, slab_ref, out_ref):
    # ---- parameter views: static, 8-aligned slices of the packed slab ----
    whh0 = slab_ref[OFF_WHH0:OFF_WHH0 + HID, :]                  # (H, H)
    w1 = slab_ref[OFF_W1:OFF_W1 + 2 * HID, :]                    # (2H, H) = [W_ih1^T ; W_hh1^T]
    fc1w = slab_ref[OFF_FC1:OFF_FC1 + HID, 0:FC1_DIM]            # (H, 16)  (gamma folded in)
    fc2w = slab_ref[OFF_FC2:OFF_FC2 + FC1_DIM, 0:N_CLASSES]      # (16, C)
    vecs = slab_ref[OFF_VEC:OFF_VEC + 8, :]                      # (8, 32)
    b0 = vecs[0:1, :]                      # b_ih0 + b_hh0 (pre-summed)
    b1 = vecs[1:2, :]                      # b_ih1 + b_hh1
    fc1b = vecs[2:3, 0:FC1_DIM]            # beta @ fc1_w^T + fc1_b (LN affine folded)
    fc2b = vecs[3:4, 0:N_CLASSES]

    def xproj0(t):
        # Layer-0 input projection for timestep t via in-kernel embedding gather:
        # emb_proj[token] already equals embedding[token] @ W_ih0^T.
        # (Out-of-range token ids are UB, same as nn.Embedding.)
        rows = [slab_ref[pl.ds(OFF_EMB + ids_ref[b, t], 1), :] for b in range(BATCH)]
        return jnp.concatenate(rows, axis=0) + b0                # (B, H)

    def l1_step(h0_prev, h1_prev):
        # One dependent dot for layer 1: [h0_t || h1_{t-1}] @ [W_ih1^T ; W_hh1^T]
        a = jnp.concatenate([h0_prev, h1_prev], axis=1)          # (B, 2H)
        return jnp.tanh(jnp.dot(a, w1, preferred_element_type=jnp.float32) + b1)

    # ---- skewed two-layer recurrence ----
    # super-step s computes layer-0 step s and layer-1 step s-1 (independent dots)
    h0 = jnp.tanh(xproj0(0))                                     # layer-0 t=0 (h_{-1}=0)
    h1 = None
    for s in range(1, SEQ):
        h0_next = jnp.tanh(
            xproj0(s) + jnp.dot(h0, whh0, preferred_element_type=jnp.float32))
        if s == 1:                                               # layer-1 t=0 (h1_{-1}=0)
            h1 = jnp.tanh(
                jnp.dot(h0, w1[0:HID, :], preferred_element_type=jnp.float32) + b1)
        else:                                                    # layer-1 t=s-1
            h1 = l1_step(h0, h1)
        h0 = h0_next
    h1 = l1_step(h0, h1)                                         # layer-1 t=SEQ-1

    # ---- LayerNorm over hidden dim (affine folded into fc1 at pack time) ----
    mean = jnp.mean(h1, axis=-1, keepdims=True)
    var = jnp.mean((h1 - mean) ** 2, axis=-1, keepdims=True)
    normed = (h1 - mean) * jax.lax.rsqrt(var + LN_EPS)

    # Dropout: identity at inference (eval mode).  fc1 -> ReLU -> fc2.
    y = jnp.maximum(
        jnp.dot(normed, fc1w, preferred_element_type=jnp.float32) + fc1b, 0.0)
    out_ref[...] = jnp.dot(y, fc2w, preferred_element_type=jnp.float32) + fc2b


def init_params(key):
    ks = jax.random.split(key, 16)
    s = 0.1
    return {
        "embedding": jax.random.normal(ks[0], (VOCAB, EMB), jnp.float32) * s,
        # PyTorch nn.RNN layout: weight_ih_l0 (H, E), weight_hh_l0 (H, H), ...
        "w_ih0": jax.random.normal(ks[1], (HID, EMB), jnp.float32) * s,
        "w_hh0": jax.random.normal(ks[2], (HID, HID), jnp.float32) * s,
        "b_ih0": jax.random.normal(ks[3], (HID,), jnp.float32) * s,
        "b_hh0": jax.random.normal(ks[4], (HID,), jnp.float32) * s,
        "w_ih1": jax.random.normal(ks[5], (HID, HID), jnp.float32) * s,
        "w_hh1": jax.random.normal(ks[6], (HID, HID), jnp.float32) * s,
        "b_ih1": jax.random.normal(ks[7], (HID,), jnp.float32) * s,
        "b_hh1": jax.random.normal(ks[8], (HID,), jnp.float32) * s,
        "gamma": jnp.ones((HID,), jnp.float32),
        "beta": jnp.zeros((HID,), jnp.float32),
        # nn.Linear layout: fc1 (16, H), fc2 (C, 16)
        "fc1_w": jax.random.normal(ks[9], (FC1_DIM, HID), jnp.float32) * s,
        "fc1_b": jax.random.normal(ks[10], (FC1_DIM,), jnp.float32) * s,
        "fc2_w": jax.random.normal(ks[11], (N_CLASSES, FC1_DIM), jnp.float32) * s,
        "fc2_b": jax.random.normal(ks[12], (N_CLASSES,), jnp.float32) * s,
    }


def pack_params(p):
    """One-time packing (outside the hot path) of all params into a (216, 32) slab.

    Pack-time folds:
      * emb_proj = embedding @ W_ih0^T  (embedding fused into the layer-0 input proj)
      * fc1w'    = gamma[:, None] * fc1_w^T,  fc1b' = beta @ fc1_w^T + fc1_b  (LN affine)
      * b0 = b_ih0 + b_hh0,  b1 = b_ih1 + b_hh1
    """
    slab = jnp.zeros((SLAB_ROWS, SLAB_COLS), jnp.float32)

    def put(s, off, a):
        a = jnp.asarray(a, jnp.float32)
        return s.at[off:off + a.shape[0], :a.shape[1]].set(a)

    emb_proj = p["embedding"].astype(jnp.float32) @ p["w_ih0"].astype(jnp.float32).T
    w1 = jnp.concatenate([p["w_ih1"].T, p["w_hh1"].T], axis=0)      # (2H, H)
    fc1w = p["gamma"][:, None] * p["fc1_w"].T                        # (H, 16)
    fc1b = p["beta"] @ p["fc1_w"].T + p["fc1_b"]                     # (16,)

    slab = put(slab, OFF_EMB, emb_proj)
    slab = put(slab, OFF_WHH0, p["w_hh0"].T)
    slab = put(slab, OFF_W1, w1)
    slab = put(slab, OFF_FC1, fc1w)
    slab = put(slab, OFF_FC2, p["fc2_w"].T)

    vecs = jnp.zeros((8, SLAB_COLS), jnp.float32)
    vecs = vecs.at[0, :HID].set(p["b_ih0"] + p["b_hh0"])
    vecs = vecs.at[1, :HID].set(p["b_ih1"] + p["b_hh1"])
    vecs = vecs.at[2, :FC1_DIM].set(fc1b)
    vecs = vecs.at[3, :N_CLASSES].set(p["fc2_b"])
    slab = put(slab, OFF_VEC, vecs)
    return slab


def sentiment_forward(token_ids, slab):
    # token_ids go straight in as (BATCH, SEQ) int32 -> SMEM; no wrapper-side
    # transpose / reshape / extra XLA op on the per-call path.
    return pl.pallas_call(
        sentiment_kernel,
        out_shape=jax.ShapeDtypeStruct((BATCH, N_CLASSES), jnp.float32),
        in_specs=[pl.BlockSpec(memory_space=pltpu.MemorySpace.SMEM),
                  pl.BlockSpec(memory_space=pltpu.MemorySpace.VMEM)],
        out_specs=pl.BlockSpec(memory_space=pltpu.MemorySpace.VMEM),
    )(token_ids, slab)


def sentiment_forward_ref(token_ids, p):
    # Pure-JAX reference (matches PyTorch semantics) for a correctness check.
    x = jnp.take(p["embedding"], token_ids, axis=0)
    B = x.shape[0]

    def layer(xs, wih, whh, bih, bhh):
        h = jnp.zeros((B, HID), jnp.float32)
        outs = []
        for t in range(xs.shape[1]):
            h = jnp.tanh(xs[:, t, :] @ wih.T + bih + h @ whh.T + bhh)
            outs.append(h)
        return jnp.stack(outs, axis=1)

    o = layer(x, p["w_ih0"], p["w_hh0"], p["b_ih0"], p["b_hh0"])
    o = layer(o, p["w_ih1"], p["w_hh1"], p["b_ih1"], p["b_hh1"])
    h = o[:, -1, :]
    mean = jnp.mean(h, axis=-1, keepdims=True)
    var = jnp.mean((h - mean) ** 2, axis=-1, keepdims=True)
    h = (h - mean) / jnp.sqrt(var + LN_EPS) * p["gamma"] + p["beta"]
    h = jnp.maximum(h @ p["fc1_w"].T + p["fc1_b"], 0.0)
    return h @ p["fc2_w"].T + p["fc2_b"]


if __name__ == "__main__":
    key = jax.random.PRNGKey(0)
    k_tok, k_param = jax.random.split(key)
    token_ids = jax.random.randint(k_tok, (BATCH, SEQ), 0, VOCAB, dtype=jnp.int32)
    params = init_params(k_param)
    slab = pack_params(params)          # done once, outside the hot path

    out = sentiment_forward(token_ids, slab)
    out = jax.block_until_ready(out)

    ref = sentiment_forward_ref(token_ids, params)
    assert out.shape == (BATCH, N_CLASSES)
    assert jnp.allclose(out, ref, rtol=1e-4, atol=1e-4)
    print("KERNEL_OK")
</pallas_src>

<mosaic_0001>
module attributes {stable_mosaic.version = 11 : i64} {
  func.func @sentiment_kernel(%arg0: memref<2x8xi32, #tpu.memory_space<smem>>, %arg1: memref<216x32xf32, #tpu.memory_space<vmem>>, %arg2: memref<2x4xf32, #tpu.memory_space<vmem>>) attributes {dimension_semantics = [], scalar_prefetch = 0 : i64, scratch_operands = 0 : i64, tpu.core_type = #tpu.core_type<tc>} {
    %c64 = arith.constant 64 : index
    %c0 = arith.constant 0 : index
    %0 = vector.load %arg1[%c64, %c0] : memref<216x32xf32, #tpu.memory_space<vmem>>, vector<32x32xf32>
    %c96 = arith.constant 96 : index
    %c0_0 = arith.constant 0 : index
    %1 = vector.load %arg1[%c96, %c0_0] : memref<216x32xf32, #tpu.memory_space<vmem>>, vector<64x32xf32>
    %c160 = arith.constant 160 : index
    %c0_1 = arith.constant 0 : index
    %2 = vector.load %arg1[%c160, %c0_1] : memref<216x32xf32, #tpu.memory_space<vmem>>, vector<32x16xf32>
    %c192 = arith.constant 192 : index
    %c0_2 = arith.constant 0 : index
    %3 = vector.load %arg1[%c192, %c0_2] : memref<216x32xf32, #tpu.memory_space<vmem>>, vector<16x4xf32>
    %c208 = arith.constant 208 : index
    %c0_3 = arith.constant 0 : index
    %4 = vector.load %arg1[%c208, %c0_3] : memref<216x32xf32, #tpu.memory_space<vmem>>, vector<8x32xf32>
    %5 = vector.extract_strided_slice %4 {offsets = [0, 0], sizes = [1, 32], strides = [1, 1]} : vector<8x32xf32> to vector<1x32xf32>
    %6 = vector.extract_strided_slice %4 {offsets = [1, 0], sizes = [1, 32], strides = [1, 1]} : vector<8x32xf32> to vector<1x32xf32>
    %7 = vector.extract_strided_slice %4 {offsets = [2, 0], sizes = [1, 16], strides = [1, 1]} : vector<8x32xf32> to vector<1x16xf32>
    %8 = vector.extract_strided_slice %4 {offsets = [3, 0], sizes = [1, 4], strides = [1, 1]} : vector<8x32xf32> to vector<1x4xf32>
    %c0_4 = arith.constant 0 : index
    %c0_5 = arith.constant 0 : index
    %9 = memref.load %arg0[%c0_4, %c0_5] : memref<2x8xi32, #tpu.memory_space<smem>>
    %c0_i32 = arith.constant 0 : i32
    %10 = arith.addi %c0_i32, %9 : i32
    %11 = arith.index_cast %10 : i32 to index
    %c0_6 = arith.constant 0 : index
    %12 = vector.load %arg1[%11, %c0_6] : memref<216x32xf32, #tpu.memory_space<vmem>>, vector<1x32xf32>
    %c1 = arith.constant 1 : index
    %c0_7 = arith.constant 0 : index
    %13 = memref.load %arg0[%c1, %c0_7] : memref<2x8xi32, #tpu.memory_space<smem>>
    %c0_i32_8 = arith.constant 0 : i32
    %14 = arith.addi %c0_i32_8, %13 : i32
    %15 = arith.index_cast %14 : i32 to index
    %c0_9 = arith.constant 0 : index
    %16 = vector.load %arg1[%15, %c0_9] : memref<216x32xf32, #tpu.memory_space<vmem>>, vector<1x32xf32>
    %17 = tpu.concatenate %12, %16 in 0 : vector<1x32xf32>, vector<1x32xf32> -> vector<2x32xf32>
    %18 = vector.broadcast %5 : vector<1x32xf32> to vector<2x32xf32>
    %19 = arith.addf %17, %18 : vector<2x32xf32>
    %20 = math.tanh %19 : vector<2x32xf32>
    %c0_10 = arith.constant 0 : index
    %c1_11 = arith.constant 1 : index
    %21 = memref.load %arg0[%c0_10, %c1_11] : memref<2x8xi32, #tpu.memory_space<smem>>
    %c0_i32_12 = arith.constant 0 : i32
    %22 = arith.addi %c0_i32_12, %21 : i32
    %23 = arith.index_cast %22 : i32 to index
    %c0_13 = arith.constant 0 : index
    %24 = vector.load %arg1[%23, %c0_13] : memref<216x32xf32, #tpu.memory_space<vmem>>, vector<1x32xf32>
    %c1_14 = arith.constant 1 : index
    %c1_15 = arith.constant 1 : index
    %25 = memref.load %arg0[%c1_14, %c1_15] : memref<2x8xi32, #tpu.memory_space<smem>>
    %c0_i32_16 = arith.constant 0 : i32
    %26 = arith.addi %c0_i32_16, %25 : i32
    %27 = arith.index_cast %26 : i32 to index
    %c0_17 = arith.constant 0 : index
    %28 = vector.load %arg1[%27, %c0_17] : memref<216x32xf32, #tpu.memory_space<vmem>>, vector<1x32xf32>
    %29 = tpu.concatenate %24, %28 in 0 : vector<1x32xf32>, vector<1x32xf32> -> vector<2x32xf32>
    %30 = vector.broadcast %5 : vector<1x32xf32> to vector<2x32xf32>
    %31 = arith.addf %29, %30 : vector<2x32xf32>
    %cst = arith.constant dense<0.000000e+00> : vector<2x32xf32>
    %32 = tpu.matmul %20, %0, %cst {dimension_numbers = #tpu.dot_dimension_numbers<[1], [0], [0], [1], [0, 0, 1, 1], [], []>} : vector<2x32xf32>, vector<32x32xf32>, vector<2x32xf32> -> vector<2x32xf32>
    %33 = arith.addf %31, %32 : vector<2x32xf32>
    %34 = math.tanh %33 : vector<2x32xf32>
    %35 = vector.extract_strided_slice %1 {offsets = [0, 0], sizes = [32, 32], strides = [1, 1]} : vector<64x32xf32> to vector<32x32xf32>
    %cst_18 = arith.constant dense<0.000000e+00> : vector<2x32xf32>
    %36 = tpu.matmul %20, %35, %cst_18 {dimension_numbers = #tpu.dot_dimension_numbers<[1], [0], [0], [1], [0, 0, 1, 1], [], []>} : vector<2x32xf32>, vector<32x32xf32>, vector<2x32xf32> -> vector<2x32xf32>
    %37 = vector.broadcast %6 : vector<1x32xf32> to vector<2x32xf32>
    %38 = arith.addf %36, %37 : vector<2x32xf32>
    %39 = math.tanh %38 : vector<2x32xf32>
    %c0_19 = arith.constant 0 : index
    %c2 = arith.constant 2 : index
    %40 = memref.load %arg0[%c0_19, %c2] : memref<2x8xi32, #tpu.memory_space<smem>>
    %c0_i32_20 = arith.constant 0 : i32
    %41 = arith.addi %c0_i32_20, %40 : i32
    %42 = arith.index_cast %41 : i32 to index
    %c0_21 = arith.constant 0 : index
    %43 = vector.load %arg1[%42, %c0_21] : memref<216x32xf32, #tpu.memory_space<vmem>>, vector<1x32xf32>
    %c1_22 = arith.constant 1 : index
    %c2_23 = arith.constant 2 : index
    %44 = memref.load %arg0[%c1_22, %c2_23] : memref<2x8xi32, #tpu.memory_space<smem>>
    %c0_i32_24 = arith.constant 0 : i32
    %45 = arith.addi %c0_i32_24, %44 : i32
    %46 = arith.index_cast %45 : i32 to index
    %c0_25 = arith.constant 0 : index
    %47 = vector.load %arg1[%46, %c0_25] : memref<216x32xf32, #tpu.memory_space<vmem>>, vector<1x32xf32>
    %48 = tpu.concatenate %43, %47 in 0 : vector<1x32xf32>, vector<1x32xf32> -> vector<2x32xf32>
    %49 = vector.broadcast %5 : vector<1x32xf32> to vector<2x32xf32>
    %50 = arith.addf %48, %49 : vector<2x32xf32>
    %cst_26 = arith.constant dense<0.000000e+00> : vector<2x32xf32>
    %51 = tpu.matmul %34, %0, %cst_26 {dimension_numbers = #tpu.dot_dimension_numbers<[1], [0], [0], [1], [0, 0, 1, 1], [], []>} : vector<2x32xf32>, vector<32x32xf32>, vector<2x32xf32> -> vector<2x32xf32>
    %52 = arith.addf %50, %51 : vector<2x32xf32>
    %53 = math.tanh %52 : vector<2x32xf32>
    %54 = tpu.concatenate %34, %39 in 1 : vector<2x32xf32>, vector<2x32xf32> -> vector<2x64xf32>
    %cst_27 = arith.constant dense<0.000000e+00> : vector<2x32xf32>
    %55 = tpu.matmul %54, %1, %cst_27 {dimension_numbers = #tpu.dot_dimension_numbers<[1], [0], [0], [1], [0, 0, 1, 1], [], []>} : vector<2x64xf32>, vector<64x32xf32>, vector<2x32xf32> -> vector<2x32xf32>
    %56 = vector.broadcast %6 : vector<1x32xf32> to vector<2x32xf32>
    %57 = arith.addf %55, %56 : vector<2x32xf32>
    %58 = math.tanh %57 : vector<2x32xf32>
    %c0_28 = arith.constant 0 : index
    %c3 = arith.constant 3 : index
    %59 = memref.load %arg0[%c0_28, %c3] : memref<2x8xi32, #tpu.memory_space<smem>>
    %c0_i32_29 = arith.constant 0 : i32
    %60 = arith.addi %c0_i32_29, %59 : i32
    %61 = arith.index_cast %60 : i32 to index
    %c0_30 = arith.constant 0 : index
    %62 = vector.load %arg1[%61, %c0_30] : memref<216x32xf32, #tpu.memory_space<vmem>>, vector<1x32xf32>
    %c1_31 = arith.constant 1 : index
    %c3_32 = arith.constant 3 : index
    %63 = memref.load %arg0[%c1_31, %c3_32] : memref<2x8xi32, #tpu.memory_space<smem>>
    %c0_i32_33 = arith.constant 0 : i32
    %64 = arith.addi %c0_i32_33, %63 : i32
    %65 = arith.index_cast %64 : i32 to index
    %c0_34 = arith.constant 0 : index
    %66 = vector.load %arg1[%65, %c0_34] : memref<216x32xf32, #tpu.memory_space<vmem>>, vector<1x32xf32>
    %67 = tpu.concatenate %62, %66 in 0 : vector<1x32xf32>, vector<1x32xf32> -> vector<2x32xf32>
    %68 = vector.broadcast %5 : vector<1x32xf32> to vector<2x32xf32>
    %69 = arith.addf %67, %68 : vector<2x32xf32>
    %cst_35 = arith.constant dense<0.000000e+00> : vector<2x32xf32>
    %70 = tpu.matmul %53, %0, %cst_35 {dimension_numbers = #tpu.dot_dimension_numbers<[1], [0], [0], [1], [0, 0, 1, 1], [], []>} : vector<2x32xf32>, vector<32x32xf32>, vector<2x32xf32> -> vector<2x32xf32>
    %71 = arith.addf %69, %70 : vector<2x32xf32>
    %72 = math.tanh %71 : vector<2x32xf32>
    %73 = tpu.concatenate %53, %58 in 1 : vector<2x32xf32>, vector<2x32xf32> -> vector<2x64xf32>
    %cst_36 = arith.constant dense<0.000000e+00> : vector<2x32xf32>
    %74 = tpu.matmul %73, %1, %cst_36 {dimension_numbers = #tpu.dot_dimension_numbers<[1], [0], [0], [1], [0, 0, 1, 1], [], []>} : vector<2x64xf32>, vector<64x32xf32>, vector<2x32xf32> -> vector<2x32xf32>
    %75 = vector.broadcast %6 : vector<1x32xf32> to vector<2x32xf32>
    %76 = arith.addf %74, %75 : vector<2x32xf32>
    %77 = math.tanh %76 : vector<2x32xf32>
    %c0_37 = arith.constant 0 : index
    %c4 = arith.constant 4 : index
    %78 = memref.load %arg0[%c0_37, %c4] : memref<2x8xi32, #tpu.memory_space<smem>>
    %c0_i32_38 = arith.constant 0 : i32
    %79 = arith.addi %c0_i32_38, %78 : i32
    %80 = arith.index_cast %79 : i32 to index
    %c0_39 = arith.constant 0 : index
    %81 = vector.load %arg1[%80, %c0_39] : memref<216x32xf32, #tpu.memory_space<vmem>>, vector<1x32xf32>
    %c1_40 = arith.constant 1 : index
    %c4_41 = arith.constant 4 : index
    %82 = memref.load %arg0[%c1_40, %c4_41] : memref<2x8xi32, #tpu.memory_space<smem>>
    %c0_i32_42 = arith.constant 0 : i32
    %83 = arith.addi %c0_i32_42, %82 : i32
    %84 = arith.index_cast %83 : i32 to index
    %c0_43 = arith.constant 0 : index
    %85 = vector.load %arg1[%84, %c0_43] : memref<216x32xf32, #tpu.memory_space<vmem>>, vector<1x32xf32>
    %86 = tpu.concatenate %81, %85 in 0 : vector<1x32xf32>, vector<1x32xf32> -> vector<2x32xf32>
    %87 = vector.broadcast %5 : vector<1x32xf32> to vector<2x32xf32>
    %88 = arith.addf %86, %87 : vector<2x32xf32>
    %cst_44 = arith.constant dense<0.000000e+00> : vector<2x32xf32>
    %89 = tpu.matmul %72, %0, %cst_44 {dimension_numbers = #tpu.dot_dimension_numbers<[1], [0], [0], [1], [0, 0, 1, 1], [], []>} : vector<2x32xf32>, vector<32x32xf32>, vector<2x32xf32> -> vector<2x32xf32>
    %90 = arith.addf %88, %89 : vector<2x32xf32>
    %91 = math.tanh %90 : vector<2x32xf32>
    %92 = tpu.concatenate %72, %77 in 1 : vector<2x32xf32>, vector<2x32xf32> -> vector<2x64xf32>
    %cst_45 = arith.constant dense<0.000000e+00> : vector<2x32xf32>
    %93 = tpu.matmul %92, %1, %cst_45 {dimension_numbers = #tpu.dot_dimension_numbers<[1], [0], [0], [1], [0, 0, 1, 1], [], []>} : vector<2x64xf32>, vector<64x32xf32>, vector<2x32xf32> -> vector<2x32xf32>
    %94 = vector.broadcast %6 : vector<1x32xf32> to vector<2x32xf32>
    %95 = arith.addf %93, %94 : vector<2x32xf32>
    %96 = math.tanh %95 : vector<2x32xf32>
    %c0_46 = arith.constant 0 : index
    %c5 = arith.constant 5 : index
    %97 = memref.load %arg0[%c0_46, %c5] : memref<2x8xi32, #tpu.memory_space<smem>>
    %c0_i32_47 = arith.constant 0 : i32
    %98 = arith.addi %c0_i32_47, %97 : i32
    %99 = arith.index_cast %98 : i32 to index
    %c0_48 = arith.constant 0 : index
    %100 = vector.load %arg1[%99, %c0_48] : memref<216x32xf32, #tpu.memory_space<vmem>>, vector<1x32xf32>
    %c1_49 = arith.constant 1 : index
    %c5_50 = arith.constant 5 : index
    %101 = memref.load %arg0[%c1_49, %c5_50] : memref<2x8xi32, #tpu.memory_space<smem>>
    %c0_i32_51 = arith.constant 0 : i32
    %102 = arith.addi %c0_i32_51, %101 : i32
    %103 = arith.index_cast %102 : i32 to index
    %c0_52 = arith.constant 0 : index
    %104 = vector.load %arg1[%103, %c0_52] : memref<216x32xf32, #tpu.memory_space<vmem>>, vector<1x32xf32>
    %105 = tpu.concatenate %100, %104 in 0 : vector<1x32xf32>, vector<1x32xf32> -> vector<2x32xf32>
    %106 = vector.broadcast %5 : vector<1x32xf32> to vector<2x32xf32>
    %107 = arith.addf %105, %106 : vector<2x32xf32>
    %cst_53 = arith.constant dense<0.000000e+00> : vector<2x32xf32>
    %108 = tpu.matmul %91, %0, %cst_53 {dimension_numbers = #tpu.dot_dimension_numbers<[1], [0], [0], [1], [0, 0, 1, 1], [], []>} : vector<2x32xf32>, vector<32x32xf32>, vector<2x32xf32> -> vector<2x32xf32>
    %109 = arith.addf %107, %108 : vector<2x32xf32>
    %110 = math.tanh %109 : vector<2x32xf32>
    %111 = tpu.concatenate %91, %96 in 1 : vector<2x32xf32>, vector<2x32xf32> -> vector<2x64xf32>
    %cst_54 = arith.constant dense<0.000000e+00> : vector<2x32xf32>
    %112 = tpu.matmul %111, %1, %cst_54 {dimension_numbers = #tpu.dot_dimension_numbers<[1], [0], [0], [1], [0, 0, 1, 1], [], []>} : vector<2x64xf32>, vector<64x32xf32>, vector<2x32xf32> -> vector<2x32xf32>
    %113 = vector.broadcast %6 : vector<1x32xf32> to vector<2x32xf32>
    %114 = arith.addf %112, %113 : vector<2x32xf32>
    %115 = math.tanh %114 : vector<2x32xf32>
    %c0_55 = arith.constant 0 : index
    %c6 = arith.constant 6 : index
    %116 = memref.load %arg0[%c0_55, %c6] : memref<2x8xi32, #tpu.memory_space<smem>>
    %c0_i32_56 = arith.constant 0 : i32
    %117 = arith.addi %c0_i32_56, %116 : i32
    %118 = arith.index_cast %117 : i32 to index
    %c0_57 = arith.constant 0 : index
    %119 = vector.load %arg1[%118, %c0_57] : memref<216x32xf32, #tpu.memory_space<vmem>>, vector<1x32xf32>
    %c1_58 = arith.constant 1 : index
    %c6_59 = arith.constant 6 : index
    %120 = memref.load %arg0[%c1_58, %c6_59] : memref<2x8xi32, #tpu.memory_space<smem>>
    %c0_i32_60 = arith.constant 0 : i32
    %121 = arith.addi %c0_i32_60, %120 : i32
    %122 = arith.index_cast %121 : i32 to index
    %c0_61 = arith.constant 0 : index
    %123 = vector.load %arg1[%122, %c0_61] : memref<216x32xf32, #tpu.memory_space<vmem>>, vector<1x32xf32>
    %124 = tpu.concatenate %119, %123 in 0 : vector<1x32xf32>, vector<1x32xf32> -> vector<2x32xf32>
    %125 = vector.broadcast %5 : vector<1x32xf32> to vector<2x32xf32>
    %126 = arith.addf %124, %125 : vector<2x32xf32>
    %cst_62 = arith.constant dense<0.000000e+00> : vector<2x32xf32>
    %127 = tpu.matmul %110, %0, %cst_62 {dimension_numbers = #tpu.dot_dimension_numbers<[1], [0], [0], [1], [0, 0, 1, 1], [], []>} : vector<2x32xf32>, vector<32x32xf32>, vector<2x32xf32> -> vector<2x32xf32>
    %128 = arith.addf %126, %127 : vector<2x32xf32>
    %129 = math.tanh %128 : vector<2x32xf32>
    %130 = tpu.concatenate %110, %115 in 1 : vector<2x32xf32>, vector<2x32xf32> -> vector<2x64xf32>
    %cst_63 = arith.constant dense<0.000000e+00> : vector<2x32xf32>
    %131 = tpu.matmul %130, %1, %cst_63 {dimension_numbers = #tpu.dot_dimension_numbers<[1], [0], [0], [1], [0, 0, 1, 1], [], []>} : vector<2x64xf32>, vector<64x32xf32>, vector<2x32xf32> -> vector<2x32xf32>
    %132 = vector.broadcast %6 : vector<1x32xf32> to vector<2x32xf32>
    %133 = arith.addf %131, %132 : vector<2x32xf32>
    %134 = math.tanh %133 : vector<2x32xf32>
    %c0_64 = arith.constant 0 : index
    %c7 = arith.constant 7 : index
    %135 = memref.load %arg0[%c0_64, %c7] : memref<2x8xi32, #tpu.memory_space<smem>>
    %c0_i32_65 = arith.constant 0 : i32
    %136 = arith.addi %c0_i32_65, %135 : i32
    %137 = arith.index_cast %136 : i32 to index
    %c0_66 = arith.constant 0 : index
    %138 = vector.load %arg1[%137, %c0_66] : memref<216x32xf32, #tpu.memory_space<vmem>>, vector<1x32xf32>
    %c1_67 = arith.constant 1 : index
    %c7_68 = arith.constant 7 : index
    %139 = memref.load %arg0[%c1_67, %c7_68] : memref<2x8xi32, #tpu.memory_space<smem>>
    %c0_i32_69 = arith.constant 0 : i32
    %140 = arith.addi %c0_i32_69, %139 : i32
    %141 = arith.index_cast %140 : i32 to index
    %c0_70 = arith.constant 0 : index
    %142 = vector.load %arg1[%141, %c0_70] : memref<216x32xf32, #tpu.memory_space<vmem>>, vector<1x32xf32>
    %143 = tpu.concatenate %138, %142 in 0 : vector<1x32xf32>, vector<1x32xf32> -> vector<2x32xf32>
    %144 = vector.broadcast %5 : vector<1x32xf32> to vector<2x32xf32>
    %145 = arith.addf %143, %144 : vector<2x32xf32>
    %cst_71 = arith.constant dense<0.000000e+00> : vector<2x32xf32>
    %146 = tpu.matmul %129, %0, %cst_71 {dimension_numbers = #tpu.dot_dimension_numbers<[1], [0], [0], [1], [0, 0, 1, 1], [], []>} : vector<2x32xf32>, vector<32x32xf32>, vector<2x32xf32> -> vector<2x32xf32>
    %147 = arith.addf %145, %146 : vector<2x32xf32>
    %148 = math.tanh %147 : vector<2x32xf32>
    %149 = tpu.concatenate %129, %134 in 1 : vector<2x32xf32>, vector<2x32xf32> -> vector<2x64xf32>
    %cst_72 = arith.constant dense<0.000000e+00> : vector<2x32xf32>
    %150 = tpu.matmul %149, %1, %cst_72 {dimension_numbers = #tpu.dot_dimension_numbers<[1], [0], [0], [1], [0, 0, 1, 1], [], []>} : vector<2x64xf32>, vector<64x32xf32>, vector<2x32xf32> -> vector<2x32xf32>
    %151 = vector.broadcast %6 : vector<1x32xf32> to vector<2x32xf32>
    %152 = arith.addf %150, %151 : vector<2x32xf32>
    %153 = math.tanh %152 : vector<2x32xf32>
    %154 = tpu.concatenate %148, %153 in 1 : vector<2x32xf32>, vector<2x32xf32> -> vector<2x64xf32>
    %cst_73 = arith.constant dense<0.000000e+00> : vector<2x32xf32>
    %155 = tpu.matmul %154, %1, %cst_73 {dimension_numbers = #tpu.dot_dimension_numbers<[1], [0], [0], [1], [0, 0, 1, 1], [], []>} : vector<2x64xf32>, vector<64x32xf32>, vector<2x32xf32> -> vector<2x32xf32>
    %156 = vector.broadcast %6 : vector<1x32xf32> to vector<2x32xf32>
    %157 = arith.addf %155, %156 : vector<2x32xf32>
    %158 = math.tanh %157 : vector<2x32xf32>
    %cst_74 = arith.constant dense<0.000000e+00> : vector<2xf32>
    %159 = vector.multi_reduction <add>, %158, %cst_74 [1] : vector<2x32xf32> to vector<2xf32>
    %160 = vector.shape_cast %159 : vector<2xf32> to vector<2x1xf32>
    %cst_75 = arith.constant 3.200000e+01 : f32
    %161 = vector.broadcast %cst_75 : f32 to vector<2x1xf32>
    %162 = arith.divf %160, %161 : vector<2x1xf32>
    %163 = vector.broadcast %162 : vector<2x1xf32> to vector<2x32xf32>
    %164 = arith.subf %158, %163 : vector<2x32xf32>
    %165 = arith.mulf %164, %164 : vector<2x32xf32>
    %cst_76 = arith.constant dense<0.000000e+00> : vector<2xf32>
    %166 = vector.multi_reduction <add>, %165, %cst_76 [1] : vector<2x32xf32> to vector<2xf32>
    %167 = vector.shape_cast %166 : vector<2xf32> to vector<2x1xf32>
    %cst_77 = arith.constant 3.200000e+01 : f32
    %168 = vector.broadcast %cst_77 : f32 to vector<2x1xf32>
    %169 = arith.divf %167, %168 : vector<2x1xf32>
    %170 = vector.broadcast %162 : vector<2x1xf32> to vector<2x32xf32>
    %171 = arith.subf %158, %170 : vector<2x32xf32>
    %cst_78 = arith.constant 9.99999974E-6 : f32
    %172 = vector.broadcast %cst_78 : f32 to vector<2x1xf32>
    %173 = arith.addf %169, %172 : vector<2x1xf32>
    %174 = math.rsqrt %173 : vector<2x1xf32>
    %175 = vector.broadcast %174 : vector<2x1xf32> to vector<2x32xf32>
    %176 = arith.mulf %171, %175 : vector<2x32xf32>
    %cst_79 = arith.constant dense<0.000000e+00> : vector<2x16xf32>
    %177 = tpu.matmul %176, %2, %cst_79 {dimension_numbers = #tpu.dot_dimension_numbers<[1], [0], [0], [1], [0, 0, 1, 1], [], []>} : vector<2x32xf32>, vector<32x16xf32>, vector<2x16xf32> -> vector<2x16xf32>
    %178 = vector.broadcast %7 : vector<1x16xf32> to vector<2x16xf32>
    %179 = arith.addf %177, %178 : vector<2x16xf32>
    %cst_80 = arith.constant 0.000000e+00 : f32
    %180 = vector.broadcast %cst_80 : f32 to vector<2x16xf32>
    %181 = arith.maximumf %179, %180 : vector<2x16xf32>
    %cst_81 = arith.constant dense<0.000000e+00> : vector<2x4xf32>
    %182 = tpu.matmul %181, %3, %cst_81 {dimension_numbers = #tpu.dot_dimension_numbers<[1], [0], [0], [1], [0, 0, 1, 1], [], []>} : vector<2x16xf32>, vector<16x4xf32>, vector<2x4xf32> -> vector<2x4xf32>
    %183 = vector.broadcast %8 : vector<1x4xf32> to vector<2x4xf32>
    %184 = arith.addf %182, %183 : vector<2x4xf32>
    %c0_82 = arith.constant 0 : index
    %c0_83 = arith.constant 0 : index
    %185 = vector.load %arg2[%c0_82, %c0_83] : memref<2x4xf32, #tpu.memory_space<vmem>>, vector<2x4xf32>
    tpu.vector_store %arg2[%c0_82, %c0_83], %184 {strides = array<i32>} : memref<2x4xf32, #tpu.memory_space<vmem>>, vector<2x4xf32>,
    return
  }
}

</mosaic_0001>

<bundles_post_ra>
// kernel: tpu_custom_call.1
= control target key start
LH: loop header
LB: loop body
LE: loop exit
PB: predicated region body
PF: predicated region fallthrough
CT: control target
= control target key end

     0   :  { %7 = vsyncpa [#allocation4], 0  ;;  %s1072_s0 = inlined_call_operand.vmem [shape: s32[2,8], index: 0, kind: input, shape index: {}]   ;;  %s1073_s1 = inlined_call_operand.vmem [shape: f32[216,32], index: 1, kind: input, shape index: {}]   ;;  %s1074_s2 = inlined_call_operand.hbm [shape: f32[2,4], index: 2, kind: output, shape index: {}]  }
   0x1   :  { %8 = vsyncpa [#allocation3], 0  ;;  %s14_s11 = sshll.u32 %s1072_s0, 4  ;;  %s764_s12 = smov [#allocation2]   ;;  %s15_s11 = int_to_ptr.vmem [resolvable:$true] %s14_s11 }
   0x2   :  { %17 = dma.vmem_to_smem %s15_s11, 32, %s764_s12, [#allocation4]  }
   0x3   :  { %760 = dma.done.wait [#allocation4], 32  }
   0x4   :  { %761 = vsyncadd [#allocation4], 4294967264 }
   0x5   :  { %24 = sfence }
   0x6   :  { %v789_v0 = vld [vmem:[%s1073_s1 + $0x78] sm:$0xff]  ;;  %v794_v1 = vld [vmem:[%s1073_s1 + $0x70] sm:$0xff]  ;;  %s44_s17 = sld [smem:[#allocation2]]  ;;  %v805_v3 = vld [vmem:[%s1073_s1 + $0x68] sm:$0xff]  ;;  %vm53_vm0 = vcmask 1040384   ;;  %vm69_vm1 = vcmask 261120  }
   0x7   :  { %108 = vmatpush.msra.mxu1 %v789_v0  ;;  %s652_s0 = sld [smem:[#allocation2 + $0x80]]  ;;  %v800_v2 = vld [vmem:[%s1073_s1 + $0x58] sm:$0xff]  ;;  %v811_v4 = vld [vmem:[%s1073_s1 + $0x50] sm:$0xff]  ;;  %v818_v5 = vld [vmem:[%s1073_s1 + $0x48] sm:$0xff]  ;;  %s765_s25 = smov 32   ;;  %vm158_vm2 = vcmask 523264  }
   0x8   :  { %85 = vmatpush.msra.mxu0 %v800_v2  ;;  %143 = vmatpush.msra.mxu2 %v800_v2  ;;  %v823_v6 = vld [vmem:[%s1073_s1 + $0x60] sm:$0xff]  ;;  %v831_v7 = vld [vmem:[%s1073_s1 + $0xd0] sm:$0xff]  ;;  %s654_s10 = sld [smem:[#allocation2 + $0x81]]  ;;  %v867_v16 = vld [vmem:[%s1073_s1 + $0x98] sm:$0xff]  ;;  %vm537_vm3 = vcmask 254976   ;;  %vm593_vm8 = vcmask 130048  }
   0x9   :  { %109 = vmatpush.msra.mxu1 %v794_v1  ;;  %v836_v8 = vld [vmem:[%s1073_s1 + $0x40] sm:$0xff]  ;;  %v848_v11 = vperm.slane %v831_v7, 0  ;;  %v872_v17 = vld [vmem:[%s1073_s1 + $0x90] sm:$0xff]  ;;  %170 = vmatpush.msra.mxu3 %v867_v16  ;;  %s653_s15 = sld [smem:[#allocation2 + $0x1]]  ;;  %v879_v18 = vld [vmem:[%s1073_s1 + $0x88] sm:$0xff]  ;;  %v919_v24 = vperm.slane %v831_v7, 1 }
   0xa   :  { %86 = vmatpush.msra.mxu0 %v811_v4  ;;  %144 = vmatpush.msra.mxu2 %v811_v4  ;;  %v887_v19 = vld [vmem:[%s1073_s1 + $0x80] sm:$0xff]  ;;  %s658_s26 = sld [smem:[#allocation2 + $0x82]]  ;;  %vm617_vm9 = vcmask 25600  }
   0xb   :  { %110 = vmatpush.msra.mxu1 %v805_v3  ;;  %171 = vmatpush.msra.mxu3 %v872_v17  ;;  %s657_s27 = sld [smem:[#allocation2 + $0x2]] }
   0xc   :  { %s45_s6 = scalar_lea.vmem %s1073_s1, %s44_s17  ;;  %87 = vmatpush.msra.mxu0 %v818_v5  ;;  %145 = vmatpush.msra.mxu2 %v818_v5  ;;  %s661_s7 = sld [smem:[#allocation2 + $0x3]] }
   0xd   :  { %111 = vmatpush.msra.mxu1 %v823_v6  ;;  %s48_s9 = scalar_lea.vmem %s1073_s1, %s652_s0  ;;  %v46_v9 = vld [vmem:[%s45_s6] sm:$0x1]  ;;  %172 = vmatpush.msra.mxu3 %v879_v18  ;;  %s662_s6 = sld [smem:[#allocation2 + $0x83]] }
   0xe   :  { %v49_v10 = vld [vmem:[%s48_s9] sm:$0x1]  ;;  %88 = vmatpush.msra.mxu0 %v836_v8  ;;  %146 = vmatpush.msra.mxu2 %v836_v8  ;;  %s62_s21 = scalar_lea.vmem %s1073_s1, %s654_s10  ;;  %s666_s14 = sld [smem:[#allocation2 + $0x84]] }
   0xf   :  { %v51_v12 = vrot.slane %v49_v10, 7  ;;  %235 = vmatpush.msrb.mxu1 %v867_v16  ;;  %173 = vmatpush.msra.mxu3 %v887_v19  ;;  %v63_v20 = vld [vmem:[%s62_s21] sm:$0x1]  ;;  %s59_s24 = scalar_lea.vmem %s1073_s1, %s653_s15  ;;  %s665_s15 = sld [smem:[#allocation2 + $0x4]] }
  0x10   :  { %209 = vmatpush.msrb.mxu0 %v800_v2  ;;  %274 = vmatpush.msrb.mxu2 %v800_v2  ;;  %v65_v21 = vrot.slane %v63_v20, 7  ;;  %v60_v22 = vld [vmem:[%s59_s24] sm:$0x1]  ;;  %s121_s30 = scalar_lea.vmem %s1073_s1, %s658_s26  ;;  %s670_s21 = sld [smem:[#allocation2 + $0x85]] }
  0x11   :  { %v54_v13 = vsel %vm53_vm0, %v46_v9, %v51_v12  ;;  %236 = vmatpush.msrb.mxu1 %v872_v17  ;;  %174 = vmatpush.msra.mxu3 %v789_v0  ;;  %v122_v34 = vld [vmem:[%s121_s30] sm:$0x1]  ;;  %s118_s5 = scalar_lea.vmem %s1073_s1, %s657_s27  ;;  %s669_s22 = sld [smem:[#allocation2 + $0x5]] }
  0x12   :  { %210 = vmatpush.msrb.mxu0 %v811_v4  ;;  %275 = vmatpush.msrb.mxu2 %v811_v4  ;;  %v56_v14 = vadd.f32 %v848_v11, %v54_v13  ;;  %v67_v23 = vsel %vm53_vm0, %v60_v22, %v65_v21  ;;  %v124_v35 = vrot.slane %v122_v34, 7  ;;  %v119_v36 = vld [vmem:[%s118_s5] sm:$0x1]  ;;  %s184_s10 = scalar_lea.vmem %s1073_s1, %s661_s7  ;;  %s674_s30 = sld [smem:[#allocation2 + $0x86]] }
  0x13   :  { %237 = vmatpush.msrb.mxu1 %v879_v18  ;;  %175 = vmatpush.msra.mxu3 %v794_v1  ;;  %v68_v25 = vadd.f32 %v67_v23, %v848_v11  ;;  %s187_s13 = scalar_lea.vmem %s1073_s1, %s662_s6  ;;  %v185_v45 = vld [vmem:[%s184_s10] sm:$0x1]  ;;  %s673_s3 = sld [smem:[#allocation2 + $0x6]] }
  0x14   :  { %211 = vmatpush.msrb.mxu0 %v818_v5  ;;  %276 = vmatpush.msrb.mxu2 %v818_v5  ;;  %688 = vtanh.f32 %v56_v14  ;;  %v126_v37 = vsel %vm53_vm0, %v119_v36, %v124_v35  ;;  %v188_v46 = vld [vmem:[%s187_s13] sm:$0x1]  ;;  %s252_s0 = scalar_lea.vmem %s1073_s1, %s666_s14  ;;  %s678_s10 = sld [smem:[#allocation2 + $0x87]] }
  0x15   :  { %238 = vmatpush.msrb.mxu1 %v887_v19  ;;  %176 = vmatpush.msra.mxu3 %v805_v3  ;;  %v127_v38 = vadd.f32 %v126_v37, %v848_v11  ;;  %v190_v47 = vrot.slane %v188_v46, 7  ;;  %s249_s20 = scalar_lea.vmem %s1073_s1, %s665_s15  ;;  %v253_v55 = vld [vmem:[%s252_s0] sm:$0x1]  ;;  %s677_s11 = sld [smem:[#allocation2 + $0x7]] }
  0x16   :  { %212 = vmatpush.msrb.mxu0 %v836_v8  ;;  %277 = vmatpush.msrb.mxu2 %v836_v8  ;;  %v255_v56 = vrot.slane %v253_v55, 7  ;;  %v250_v57 = vld [vmem:[%s249_s20] sm:$0x1]  ;;  %s317_s26 = scalar_lea.vmem %s1073_s1, %s670_s21  ;;  %v766_v55 = vmov 32.0   ;;  %s626_s5 = sshll.u32 %s1074_s2, 4  ;;  %s627_s5 = int_to_ptr.hbm [resolvable:$true] %s626_s5 }
  0x17   :  { %239 = vmatpush.msrb.mxu1 %v789_v0  ;;  %177 = vmatpush.msra.mxu3 %v823_v6  ;;  %v192_v48 = vsel %vm53_vm0, %v185_v45, %v190_v47  ;;  %s314_s29 = scalar_lea.vmem %s1073_s1, %s669_s22 }
  0x18   :  { %v193_v50 = vadd.f32 %v192_v48, %v848_v11  ;;  %v257_v58 = vsel %vm53_vm0, %v250_v57, %v255_v56  ;;  %s382_s6 = scalar_lea.vmem %s1073_s1, %s674_s30 }
  0x19   :  { %240 = vmatpush.msrb.mxu1 %v794_v1  ;;  %365 = vmatpush.msrb.mxu3 %v867_v16  ;;  %v258_v59 = vadd.f32 %v257_v58, %v848_v11  ;;  %s379_s9 = scalar_lea.vmem %s1073_s1, %s673_s3 }
  0x1a   :  { %v689_v15 = vpop.eup %688  ;;  %s447_s14 = scalar_lea.vmem %s1073_s1, %s678_s10 }
  0x1b   :  { %656 = vmatmul.msk.f32.vlgmr.msra.gmra.mxu1 %vm69_vm1, %v689_v15  ;;  %655 = vmatmul.msk.f32.vlgmr.msra.gmra.mxu0 %vm69_vm1, %v689_v15  ;;  %s444_s17 = scalar_lea.vmem %s1073_s1, %s677_s11 }
  0x1c   :  { %300 = vmatpush.msra.mxu0 %v867_v16  ;;  %241 = vmatpush.msrb.mxu1 %v805_v3 }
  0x1d   :  { %366 = vmatpush.msrb.mxu3 %v872_v17 }
  0x1e   :  { %301 = vmatpush.msra.mxu0 %v872_v17  ;;  %242 = vmatpush.msrb.mxu1 %v823_v6 }
  0x1f   :  { %367 = vmatpush.msrb.mxu3 %v879_v18 }
  0x20   :  { %302 = vmatpush.msra.mxu0 %v879_v18  ;;  %404 = vmatpush.msra.mxu1 %v800_v2 }
  0x21   :  { %368 = vmatpush.msrb.mxu3 %v887_v19 }
  0x22   :  { %303 = vmatpush.msra.mxu0 %v887_v19  ;;  %405 = vmatpush.msra.mxu1 %v811_v4 }
  0x23   :  { %369 = vmatpush.msrb.mxu3 %v789_v0 }
  0x24   :  { %304 = vmatpush.msra.mxu0 %v789_v0  ;;  %406 = vmatpush.msra.mxu1 %v818_v5 }
  0x25   :  { %370 = vmatpush.msrb.mxu3 %v794_v1 }
  0x26   :  { %305 = vmatpush.msra.mxu0 %v794_v1  ;;  %407 = vmatpush.msra.mxu1 %v836_v8 }
  0x27   :  { %371 = vmatpush.msrb.mxu3 %v805_v3 }
  0x28   :  { %306 = vmatpush.msra.mxu0 %v805_v3 }
  0x29   :  { %372 = vmatpush.msrb.mxu3 %v823_v6 }
  0x2a   :  { %307 = vmatpush.msra.mxu0 %v823_v6 }
  0x98   :  { %v113_v26 = vpop.f32.mrf.mxu1  ;;  %v90_v27 = vpop.f32.mrf.mxu0 }
  0x99   :  { %v114_v28 = vadd.f32 %v113_v26, %v919_v24  ;;  %v93_v29 = vadd.f32 %v90_v27, %v68_v25 }
  0x9b   :  { %690 = vtanh.f32 %v114_v28 }
  0x9c   :  { %692 = vtanh.f32 %v93_v29 }
  0xa1   :  { %v691_v30 = vpop.eup %690 }
  0xa2   :  { %v693_v31 = vpop.eup %692  ;;  %154 = vrot.lane.b32.xlu0 %v691_v30, %s765_s25 }
  0xa3   :  { %659 = vmatmul.msk.f32.vlgmr.msra.gmra.mxu2 %vm69_vm1, %v693_v31 }
  0xa4   :  { %339 = vmatpush.msra.mxu2 %v800_v2 }
  0xa6   :  { %340 = vmatpush.msra.mxu2 %v811_v4 }
  0xa8   :  { %341 = vmatpush.msra.mxu2 %v818_v5 }
  0xaa   :  { %342 = vmatpush.msra.mxu2 %v836_v8 }
 0x114   :  { %v155_v32 = vpop.permute.xlu0 %154 }
 0x115   :  { %v157_v33 = vsel %vm69_vm1, %v693_v31, %v155_v32 }
 0x116   :  { %660 = vmatmul.msk.f32.vlgmr.msra.gmra.mxu3 %vm158_vm2, %v157_v33 }
 0x117   :  { %524 = vmatpush.msra.mxu3 %v867_v16 }
 0x119   :  { %525 = vmatpush.msra.mxu3 %v872_v17 }
 0x11b   :  { %526 = vmatpush.msra.mxu3 %v879_v18 }
 0x11d   :  { %527 = vmatpush.msra.mxu3 %v887_v19 }
 0x11f   :  { %528 = vmatpush.msra.mxu3 %v789_v0 }
 0x121   :  { %529 = vmatpush.msra.mxu3 %v794_v1 }
 0x123   :  { %530 = vmatpush.msra.mxu3 %v805_v3 }
 0x125   :  { %531 = vmatpush.msra.mxu3 %v823_v6 }
 0x126   :  { %v148_v39 = vpop.f32.mrf.mxu2 }
 0x127   :  { %v151_v40 = vadd.f32 %v148_v39, %v127_v38 }
 0x129   :  { %694 = vtanh.f32 %v151_v40 }
 0x12f   :  { %v695_v41 = vpop.eup %694 }
 0x130   :  { %663 = vmatmul.msk.f32.vlgmr.msrb.gmra.mxu0 %vm69_vm1, %v695_v41 }
 0x131   :  { %469 = vmatpush.msrb.mxu0 %v800_v2  ;;  %v318_v2 = vld [vmem:[%s317_s26] sm:$0x1] }
 0x133   :  { %470 = vmatpush.msrb.mxu0 %v811_v4  ;;  %v315_v4 = vld [vmem:[%s314_s29] sm:$0x1]  ;;  %s767_s29 = smov [#allocation5]  }
 0x134   :  { %s624_s30 = sshll.u32 %s767_s29, 4  ;;  %s625_s30 = int_to_ptr.vmem [resolvable:$true] %s624_s30 }
 0x135   :  { %471 = vmatpush.msrb.mxu0 %v818_v5 }
 0x137   :  { %472 = vmatpush.msrb.mxu0 %v836_v8 }
 0x199   :  { %v179_v42 = vpop.f32.mrf.mxu3 }
 0x19a   :  { %v180_v43 = vadd.f32 %v179_v42, %v919_v24 }
 0x19c   :  { %696 = vtanh.f32 %v180_v43  ;;  %v445_v43 = vld [vmem:[%s444_s17] sm:$0x1] }
 0x1a2   :  { %v697_v44 = vpop.eup %696 }
 0x1a3   :  { %220 = vrot.lane.b32.xlu0 %v697_v44, %s765_s25 }
 0x1ad   :  { %v214_v49 = vpop.f32.mrf.mxu0 }
 0x1ae   :  { %v217_v51 = vadd.f32 %v214_v49, %v193_v50 }
 0x1b0   :  { %698 = vtanh.f32 %v217_v51 }
 0x1b6   :  { %v699_v52 = vpop.eup %698 }
 0x1b7   :  { %667 = vmatmul.msk.f32.vlgmr.msrb.gmra.mxu2 %vm69_vm1, %v699_v52 }
 0x1b8   :  { %430 = vmatpush.msrb.mxu2 %v867_v16 }
 0x1ba   :  { %431 = vmatpush.msrb.mxu2 %v872_v17 }
 0x1bc   :  { %432 = vmatpush.msrb.mxu2 %v879_v18 }
 0x1be   :  { %433 = vmatpush.msrb.mxu2 %v887_v19 }
 0x1c0   :  { %434 = vmatpush.msrb.mxu2 %v789_v0 }
 0x1c2   :  { %435 = vmatpush.msrb.mxu2 %v794_v1 }
 0x1c4   :  { %436 = vmatpush.msrb.mxu2 %v805_v3 }
 0x1c6   :  { %437 = vmatpush.msrb.mxu2 %v823_v6 }
 0x215   :  { %v221_v53 = vpop.permute.xlu0 %220 }
 0x216   :  { %v223_v54 = vsel %vm69_vm1, %v695_v41, %v221_v53  ;;  %v448_v41 = vld [vmem:[%s447_s14] sm:$0x1] }
 0x217   :  { %664 = vmatmul.msk.f32.vlgmr.msrb.gmra.mxu1 %vm158_vm2, %v223_v54  ;;  %v450_v42 = vrot.slane %v448_v41, 7 }
 0x218   :  { %495 = vmatpush.msrb.mxu1 %v867_v16  ;;  %v383_v16 = vld [vmem:[%s382_s6] sm:$0x1] }
 0x219   :  { %v452_v44 = vsel %vm53_vm0, %v445_v43, %v450_v42 }
 0x21a   :  { %496 = vmatpush.msrb.mxu1 %v872_v17  ;;  %v385_v17 = vrot.slane %v383_v16, 7  ;;  %v453_v45 = vadd.f32 %v452_v44, %v848_v11 }
 0x21c   :  { %497 = vmatpush.msrb.mxu1 %v879_v18  ;;  %v380_v18 = vld [vmem:[%s379_s9] sm:$0x1] }
 0x21e   :  { %498 = vmatpush.msrb.mxu1 %v887_v19  ;;  %v387_v19 = vsel %vm53_vm0, %v380_v18, %v385_v17 }
 0x21f   :  { %v388_v21 = vadd.f32 %v387_v19, %v848_v11  ;;  %v41_v19 = vld [vmem:[%s1073_s1 + $0xc0] sm:$0xff] }
 0x220   :  { %499 = vmatpush.msrb.mxu1 %v789_v0 }
 0x222   :  { %500 = vmatpush.msrb.mxu1 %v794_v1 }
 0x224   :  { %501 = vmatpush.msrb.mxu1 %v805_v3  ;;  %v320_v3 = vrot.slane %v318_v2, 7  ;;  %v39_v2 = vld [vmem:[%s1073_s1 + $0xb0] sm:$0xff] }
 0x226   :  { %502 = vmatpush.msrb.mxu1 %v823_v6  ;;  %v322_v6 = vsel %vm53_vm0, %v315_v4, %v320_v3  ;;  %v38_v3 = vld [vmem:[%s1073_s1 + $0xa8] sm:$0xff]  ;;  %v37_v4 = vld [vmem:[%s1073_s1 + $0xa0] sm:$0xff] }
 0x227   :  { %v323_v9 = vadd.f32 %v322_v6, %v848_v11 }
 0x23a   :  { %v279_v60 = vpop.f32.mrf.mxu2 }
 0x23b   :  { %v282_v61 = vadd.f32 %v279_v60, %v258_v59 }
 0x23d   :  { %700 = vtanh.f32 %v282_v61 }
 0x243   :  { %v701_v62 = vpop.eup %700 }
 0x244   :  { %671 = vmatmul.msk.f32.vlgmr.msra.gmra.mxu2 %vm69_vm1, %v701_v62 }
 0x294   :  { %v244_v63 = vpop.f32.mrf.mxu1 }
 0x295   :  { %v245_v0 = vadd.f32 %v244_v63, %v919_v24 }
 0x297   :  { %702 = vtanh.f32 %v245_v0 }
 0x29d   :  { %v703_v1 = vpop.eup %702 }
 0x29e   :  { %285 = vrot.lane.b32.xlu1 %v703_v1, %s765_s25  ;;  %v40_v1 = vld [vmem:[%s1073_s1 + $0xb8] sm:$0xff] }
 0x2c7   :  { %v344_v10 = vpop.f32.mrf.mxu2 }
 0x2c8   :  { %v347_v12 = vadd.f32 %v344_v10, %v323_v9 }
 0x2ca   :  { %704 = vtanh.f32 %v347_v12 }
 0x2d0   :  { %v705_v13 = vpop.eup %704 }
 0x2d1   :  { %675 = vmatmul.msk.f32.vlgmr.msra.gmra.mxu1 %vm69_vm1, %v705_v13 }
 0x310   :  { %v286_v5 = vpop.permute.xlu1 %285 }
 0x311   :  { %v288_v8 = vsel %vm69_vm1, %v699_v52, %v286_v5  ;;  %v42_v5 = vld [vmem:[%s1073_s1 + $0xc8] sm:$0xff] }
 0x312   :  { %668 = vmatmul.msk.f32.vlgmr.msra.gmra.mxu0 %vm158_vm2, %v288_v8  ;;  %611 = vmatpush.msra.mxu2 %v42_v5 }
 0x313   :  { %583 = vmatpush.msra.mxu0 %v40_v1 }
 0x314   :  { %612 = vmatpush.msra.mxu2 %v41_v19 }
 0x315   :  { %584 = vmatpush.msra.mxu0 %v39_v2 }
 0x317   :  { %585 = vmatpush.msra.mxu0 %v38_v3 }
 0x319   :  { %586 = vmatpush.msra.mxu0 %v37_v4 }
 0x34e   :  { %v409_v22 = vpop.f32.mrf.mxu1 }
 0x34f   :  { %v412_v23 = vadd.f32 %v409_v22, %v388_v21 }
 0x38f   :  { %v309_v14 = vpop.f32.mrf.mxu0 }
 0x390   :  { %v310_v15 = vadd.f32 %v309_v14, %v919_v24 }
 0x392   :  { %706 = vtanh.f32 %v310_v15 }
 0x393   :  { %708 = vtanh.f32 %v412_v23 }
 0x398   :  { %v707_v20 = vpop.eup %706 }
 0x399   :  { %350 = vrot.lane.b32.xlu1 %v707_v20, %s765_s25  ;;  %v709_v25 = vpop.eup %708  ;;  %v567_v20 = vperm.slane %v831_v7, 2 }
 0x39a   :  { %679 = vmatmul.msk.f32.vlgmr.msrb.gmra.mxu0 %vm69_vm1, %v709_v25 }
 0x40b   :  { %v351_v26 = vpop.permute.xlu1 %350 }
 0x40c   :  { %v353_v27 = vsel %vm69_vm1, %v701_v62, %v351_v26 }
 0x40d   :  { %672 = vmatmul.msk.f32.vlgmr.msrb.gmra.mxu3 %vm158_vm2, %v353_v27 }
 0x417   :  { %v474_v46 = vpop.f32.mrf.mxu0 }
 0x418   :  { %v477_v47 = vadd.f32 %v474_v46, %v453_v45 }
 0x490   :  { %v374_v28 = vpop.f32.mrf.mxu3 }
 0x491   :  { %v375_v29 = vadd.f32 %v374_v28, %v919_v24 }
 0x493   :  { %710 = vtanh.f32 %v375_v29 }
 0x499   :  { %v711_v30 = vpop.eup %710 }
 0x49a   :  { %415 = vrot.lane.b32.xlu2 %v711_v30, %s765_s25 }
 0x4f4   :  { %v416_v31 = vpop.permute.xlu2 %415 }
 0x4f5   :  { %v418_v32 = vsel %vm69_vm1, %v705_v13, %v416_v31 }
 0x4f6   :  { %676 = vmatmul.msk.f32.vlgmr.msrb.gmra.mxu2 %vm158_vm2, %v418_v32 }
 0x579   :  { %v439_v33 = vpop.f32.mrf.mxu2 }
 0x57a   :  { %v440_v34 = vadd.f32 %v439_v33, %v919_v24 }
 0x57c   :  { %712 = vtanh.f32 %v440_v34 }
 0x582   :  { %v713_v35 = vpop.eup %712 }
 0x583   :  { %480 = vrot.lane.b32.xlu2 %v713_v35, %s765_s25 }
 0x5dd   :  { %v481_v36 = vpop.permute.xlu2 %480 }
 0x5de   :  { %v483_v37 = vsel %vm69_vm1, %v709_v25, %v481_v36  ;;  %v592_v25 = vperm.slane %v831_v7, 3 }
 0x5df   :  { %680 = vmatmul.msk.f32.vlgmr.msrb.gmra.mxu1 %vm158_vm2, %v483_v37 }
 0x65c   :  { %v504_v38 = vpop.f32.mrf.mxu1 }
 0x65d   :  { %v505_v39 = vadd.f32 %v504_v38, %v919_v24 }
 0x65f   :  { %714 = vtanh.f32 %v505_v39 }
 0x660   :  { %716 = vtanh.f32 %v477_v47 }
 0x665   :  { %v715_v40 = vpop.eup %714 }
 0x666   :  { %509 = vrot.lane.b32.xlu0 %v715_v40, %s765_s25  ;;  %v717_v48 = vpop.eup %716 }
 0x6d8   :  { %v510_v49 = vpop.permute.xlu0 %509 }
 0x6d9   :  { %v512_v50 = vsel %vm69_vm1, %v717_v48, %v510_v49 }
 0x6da   :  { %681 = vmatmul.msk.f32.vlgmr.msra.gmra.mxu3 %vm158_vm2, %v512_v50 }
 0x75d   :  { %v533_v51 = vpop.f32.mrf.mxu3 }
 0x75e   :  { %v534_v52 = vadd.f32 %v533_v51, %v919_v24 }
 0x760   :  { %718 = vtanh.f32 %v534_v52 }
 0x761   :  { %720 = vrcp.f32 %v766_v55 }
 0x766   :  { %v719_v53 = vpop.eup %718 }
 0x767   :  { %v538_v54 = vsel %vm537_vm3, %v719_v53, 0.0  ;;  %v721_v11 = vpop.eup %720 }
 0x768   :  { %539 = vadd.xlane.f32.xlu1 %v538_v54  ;;  %v542_v56 = vmul.f32 32.0, %v721_v11  ;;  %vm546_vm4 = vweird.f32 %v721_v11 }
 0x76a   :  { %v543_v57 = vsub.f32 1.0, %v542_v56 }
 0x76c   :  { %v544_v58 = vmul.f32 %v721_v11, %v543_v57 }
 0x76e   :  { %v545_v59 = vadd.f32 %v721_v11, %v544_v58 }
 0x770   :  { %v547_v60 = vsel %vm546_vm4, %v721_v11, %v545_v59 }
 0x7db   :  { %v540_v61 = vpop.xlane.xlu1 %539 }
 0x7dc   :  { %v548_v62 = vmul.f32 %v547_v60, %v540_v61 }
 0x7de   :  { %v549_v63 = vsub.f32 %v719_v53, %v548_v62 }
 0x7e0   :  { %v550_v0 = vmul.f32 %v549_v63, %v549_v63 }
 0x7e2   :  { %v551_v24 = vsel %vm537_vm3, %v550_v0, 0.0 }
 0x7e3   :  { %552 = vadd.xlane.f32.xlu2 %v551_v24 }
 0x856   :  { %v553_v6 = vpop.xlane.xlu2 %552 }
 0x857   :  { %v554_v8 = vmul.f32 %v553_v6, %v547_v60 }
 0x859   :  { %v555_v9 = vadd.f32 1e-05, %v554_v8 }
 0x85b   :  { %722 = vrsqrt.f32 %v555_v9  ;;  %vm562_vm6 = vweird.f32 %v555_v9 }
 0x861   :  { %v723_v10 = vpop.eup %722 }
 0x862   :  { %v557_v12 = vmul.f32 %v723_v10, %v555_v9  ;;  %vm563_vm5 = vweird.f32 %v723_v10 }
 0x863   :  { %vm564_vm7 = vmor %vm562_vm6, %vm563_vm5 }
 0x864   :  { %v558_v13 = vmul.f32 %v723_v10, %v557_v12 }
 0x866   :  { %v559_v14 = vmul.f32 0.5, %v558_v13 }
 0x868   :  { %v560_v15 = vsub.f32 1.5, %v559_v14 }
 0x86a   :  { %v561_v16 = vmul.f32 %v723_v10, %v560_v15 }
 0x86c   :  { %v565_v17 = vsel %vm564_vm7, %v723_v10, %v561_v16 }
 0x86d   :  { %v566_v18 = vmul.f32 %v565_v17, %v549_v63 }
 0x86f   :  { %682 = vmatmul.msk.f32.vlgmr.msra.gmra.mxu0 %vm69_vm1, %v566_v18 }
 0x8ec   :  { %v588_v21 = vpop.f32.mrf.mxu0 }
 0x8ed   :  { %v589_v22 = vadd.f32 %v588_v21, %v567_v20 }
 0x8ef   :  { %v591_v23 = vmax.f32 %v589_v22, 0.0 }
 0x8f1   :  { %683 = vmatmul.msk.f32.vlgmr.msra.gmra.mxu2 %vm593_vm8, %v591_v23 }
 0x974   :  { %v614_v26 = vpop.f32.mrf.mxu2 }
 0x975   :  { %v615_v27 = vadd.f32 %v614_v26, %v592_v25 }
 0x977   :  { %618 = vst.msk [vmem:[#allocation5] sm:$0x3] %vm617_vm9, %v615_v27 }
 0x978   :  { %629 = dma.vmem_to_hbm [thread:$0]  %s625_s30, 32, %s627_s5, [#allocation3]  }
 0x979   :  { %762 = dma.done.wait [#allocation3], 32  }
 0x97a   :  { %763 = vsyncadd [#allocation3], 4294967264 }
 0x97b   :  { %634 = vsyncpa [#allocation3], 1 }
 0x97c   :  { %635 = vsyncpa [#allocation4], 1 }

</bundles_post_ra>
